<compile_context>
chip_gen: v6e
topology: v6e:2x2x1
jax: 0.10.0
libtpu: 0.0.40
codegen_flags: <defaults>
</compile_context>

<pallas_src>
import functools

import jax
import jax.numpy as jnp
from jax.experimental import pallas as pl
from jax.experimental.pallas import tpu as pltpu


def _round_up(x, m):
    return ((x + m - 1) // m) * m


def _gap_loss_kernel(adj_ref, omp_ref, probe_ref, out_ref, acc_ref, *, compute_dtype):
    k = pl.program_id(1)

    @pl.when(k == 0)
    def _():
        acc_ref[...] = jnp.zeros_like(acc_ref)

    # m[r, c] += sum_j adj[r, j] * ((1 - probe[j, c]) / Tao[c])
    # MXU contraction over the K tile; operands in compute_dtype, f32 accumulation.
    acc_ref[...] += jnp.dot(
        adj_ref[...].astype(compute_dtype),
        omp_ref[...],
        preferred_element_type=jnp.float32,
    )

    @pl.when(k == pl.num_programs(1) - 1)
    def _():
        # partial = sum_{r,c} probe[r,c] * m[r,c]   (tiny TM*P elementwise + reduce)
        partial = jnp.sum(probe_ref[...].astype(jnp.float32) * acc_ref[...])
        # Lane-dense per-row-tile output block (unmasked stores); wrapper reads [:,0,0].
        out_ref[...] = jnp.broadcast_to(partial, out_ref.shape)


@functools.partial(
    jax.jit,
    static_argnames=("tile_m", "tile_k", "mxu_dtype", "vmem_budget_bytes"),
)
def gap_loss(adj_matrix, probe_matrix, degree_vector, *, tile_m=None, tile_k=None,
             mxu_dtype=jnp.bfloat16, vmem_budget_bytes=None):
    n, p = probe_matrix.shape
    assert adj_matrix.shape == (n, n)
    assert degree_vector.shape == (n, 1)

    probe_matrix = probe_matrix.astype(jnp.float32)
    degree_vector = degree_vector.astype(jnp.float32)
    # Do NOT up-cast adj here: the kernel streams it in the caller's dtype and casts the
    # tile in VMEM. Only non-float (bool/int) adjacencies are converted once (v7x has no
    # integer MXU path).
    if not jnp.issubdtype(adj_matrix.dtype, jnp.floating):
        adj_matrix = adj_matrix.astype(mxu_dtype)

    # ---- hoisted O(N*P) prework: Tao and (1 - probe)/Tao ---------------------------
    hp = jax.lax.Precision.HIGHEST
    tao = jnp.matmul(probe_matrix.T, degree_vector, precision=hp)[:, 0]      # (P,)
    omp_scaled = ((1.0 - probe_matrix) / tao).astype(mxu_dtype)              # (N, P)

    # ---- generation-aware VMEM budget (counts 128-lane padding of P operands) ------
    if vmem_budget_bytes is None:
        try:
            vmem_cap = int(pltpu.get_tpu_info().vmem_capacity_bytes)
        except Exception:
            vmem_cap = 64 * 1024 * 1024            # v7x-safe fallback
        vmem_budget_bytes = (vmem_cap * 3) // 4
    else:
        vmem_cap = max(vmem_budget_bytes * 4 // 3, 64 * 1024 * 1024)

    p_pad = _round_up(p, 128)                      # P axis is lane-padded to 128
    adj_bytes = jnp.dtype(adj_matrix.dtype).itemsize
    cmp_bytes = jnp.dtype(mxu_dtype).itemsize

    def omp_vmem(tk):                              # 2 pipeline buffers, lane padded
        return 2 * _round_up(tk, 16) * p_pad * cmp_bytes

    # ---- contraction (K) tiling: keep (1-probe)/Tao resident when it fits ----------
    if tile_k is None:
        if omp_vmem(n) <= vmem_budget_bytes // 4:
            tile_k = n                             # fully resident; grid_k == 1
        else:
            tile_k = 2048                          # v7x / very-large-N fallback
            while omp_vmem(tile_k) > vmem_budget_bytes // 4 and tile_k > 512:
                tile_k //= 2
    assert tile_k == n or tile_k % 128 == 0, tile_k
    grid_k = pl.cdiv(n, tile_k)
    n_pad_k = grid_k * tile_k
    k_lane = _round_up(tile_k, 128)

    # ---- row (M) tiling: large double-buffered adj tiles, but keep grid_m >= 2 -----
    def row_vmem(tm):
        tm_sub = _round_up(tm, 16)
        return (2 * tm_sub * k_lane * adj_bytes    # adj row tile, double buffered
                + 2 * tm_sub * p_pad * 4           # probe row tile (f32)
                + tm_sub * p_pad * 4)              # f32 accumulator scratch

    if tile_m is None:
        avail = vmem_budget_bytes - omp_vmem(min(tile_k, n)) - 2 * 8 * 128 * 4
        if n <= 16:
            tile_m = n
        else:
            tile_m = 16
            while (tile_m * 2 <= 1024
                   and row_vmem(tile_m * 2) <= avail
                   and pl.cdiv(n, tile_m * 2) >= 2):   # keep both v7x TCs busy
                tile_m *= 2
    assert tile_m == n or tile_m % 8 == 0, tile_m
    grid_m = pl.cdiv(n, tile_m)
    n_pad_m = grid_m * tile_m

    # ---- zero-pad to tile multiples (exact: padded rows/cols contribute 0) ---------
    if (n_pad_m, n_pad_k) != (n, n):
        adj_matrix = jnp.pad(adj_matrix, ((0, n_pad_m - n), (0, n_pad_k - n)))
    probe_s = (jnp.pad(probe_matrix, ((0, n_pad_m - n), (0, 0)))
               if n_pad_m != n else probe_matrix)
    if n_pad_k != n:
        omp_scaled = jnp.pad(omp_scaled, ((0, n_pad_k - n), (0, 0)))

    vmem_needed = omp_vmem(min(tile_k, n_pad_k)) + row_vmem(tile_m) + 2 * 8 * 128 * 4
    vmem_limit = max(int(vmem_needed * 1.3), 32 * 1024 * 1024)
    vmem_limit = min(max(vmem_limit, vmem_needed + (1 << 20)), (vmem_cap * 9) // 10)

    kernel = functools.partial(_gap_loss_kernel, compute_dtype=mxu_dtype)
    partials = pl.pallas_call(
        kernel,
        out_shape=jax.ShapeDtypeStruct((grid_m, 8, 128), jnp.float32),
        grid_spec=pltpu.PrefetchScalarGridSpec(
            num_scalar_prefetch=0,
            grid=(grid_m, grid_k),
            in_specs=[
                # adj: streamed (tile_m, tile_k) tile — the dominant HBM traffic.
                pl.BlockSpec((tile_m, tile_k), lambda i, k: (i, k)),
                # (1 - probe)/Tao: (tile_k, P) tile; constant block index when grid_k==1
                # (effectively resident; Pallas revisits without re-DMA).
                pl.BlockSpec((tile_k, p), lambda i, k: (k, 0)),
                # raw probe row tile (tile_m, P) — tiny side stream (item_1 never hits HBM).
                pl.BlockSpec((tile_m, p), lambda i, k: (i, 0)),
            ],
            out_specs=pl.BlockSpec((1, 8, 128), lambda i, k: (i, 0, 0)),
            scratch_shapes=[pltpu.VMEM((tile_m, p), jnp.float32)],
        ),
        compiler_params=pltpu.CompilerParams(
            dimension_semantics=("parallel", "arbitrary"),
            vmem_limit_bytes=int(vmem_limit),
        ),
    )(adj_matrix, omp_scaled, probe_s)

    return jnp.sum(partials[:, 0, 0])


def gap_loss_ref(adj_matrix, probe_matrix, degree_vector):
    hp = jax.lax.Precision.HIGHEST
    tao = jnp.matmul(probe_matrix.T, degree_vector, precision=hp)[:, 0]
    item_1 = probe_matrix / tao
    item_2 = (1.0 - probe_matrix).T
    return jnp.sum(jnp.matmul(item_1, item_2, precision=hp) * adj_matrix)


if __name__ == "__main__":
    key = jax.random.PRNGKey(0)
    k_adj, k_probe = jax.random.split(key)

    num_node, nparts = 256, 8

    # Synthetic symmetric 0/1 adjacency, degree = row sums (+1 so Tao > 0),
    # probe = softmax over partitions.
    adj_raw = (jax.random.uniform(k_adj, (num_node, num_node)) < 0.1).astype(jnp.float32)
    adj = jnp.maximum(adj_raw, adj_raw.T)
    adj = adj * (1.0 - jnp.eye(num_node, dtype=jnp.float32))
    degree = jnp.sum(adj, axis=1, keepdims=True) + 1.0           # (N, 1)
    probe = jax.nn.softmax(jax.random.normal(k_probe, (num_node, nparts)), axis=-1)

    ref = gap_loss_ref(adj, probe, degree)

    # Default path: bf16 MXU operands (exact for 0/1 adjacency), resident (1-probe)/Tao,
    # auto tile_m -> 2 row tiles (grid_m >= 2 for v7x megacore).
    loss = gap_loss(adj, probe, degree)
    jax.block_until_ready(loss)
    assert jnp.allclose(loss, ref, rtol=1e-2, atol=1e-2), (loss, ref)

    # Exact-f32 MXU path (preserves the module's f32 numerics for general-valued adj).
    loss_f32 = gap_loss(adj, probe, degree, mxu_dtype=jnp.float32)
    jax.block_until_ready(loss_f32)
    assert jnp.allclose(loss_f32, ref, rtol=1e-4, atol=1e-4), (loss_f32, ref)

    # Forced K-tiled fallback (exercises the pl.when init/accumulate/finalize path used
    # when (1-probe)/Tao cannot stay resident in v7x's 64 MiB VMEM).
    loss_kt = gap_loss(adj, probe, degree, tile_m=64, tile_k=128)
    jax.block_until_ready(loss_kt)
    assert jnp.allclose(loss_kt, ref, rtol=1e-2, atol=1e-2), (loss_kt, ref)

    print("KERNEL_OK")
</pallas_src>

<mosaic_0001>
module attributes {stable_mosaic.version = 11 : i64} {
  func.func @_gap_loss_kernel(%arg0: i32, %arg1: i32, %arg2: memref<128x256xf32, #tpu.memory_space<vmem>>, %arg3: memref<256x8xbf16, #tpu.memory_space<vmem>>, %arg4: memref<128x8xf32, #tpu.memory_space<vmem>>, %arg5: memref<1x8x128xf32, #tpu.memory_space<vmem>>, %arg6: memref<128x8xf32, #tpu.memory_space<vmem>>) attributes {dimension_semantics = [#tpu.dimension_semantics<parallel>, #tpu.dimension_semantics<arbitrary>], iteration_bounds = array<i64: 2, 1>, scalar_prefetch = 0 : i64, scratch_operands = 1 : i64, tpu.core_type = #tpu.core_type<tc>, window_params = [{transform_indices = @transform_0, window_bounds = array<i64: 128, 256>}, {transform_indices = @transform_1, window_bounds = array<i64: 256, 8>}, {transform_indices = @transform_2, window_bounds = array<i64: 128, 8>}, {transform_indices = @transform_3, window_bounds = array<i64: 1, 8, 128>}]} {
    %c0_i32 = arith.constant 0 : i32
    %0 = arith.cmpi eq, %arg1, %c0_i32 : i32
    %1 = arith.extui %0 : i1 to i32
    %c0_i32_0 = arith.constant 0 : i32
    %2 = arith.cmpi ne, %1, %c0_i32_0 : i32
    scf.if %2 {
      %cst_10 = arith.constant 0.000000e+00 : f32
      %13 = vector.broadcast %cst_10 : f32 to vector<128x8xf32>
      %c0_11 = arith.constant 0 : index
      %c0_12 = arith.constant 0 : index
      %14 = vector.load %arg6[%c0_11, %c0_12] : memref<128x8xf32, #tpu.memory_space<vmem>>, vector<128x8xf32>
      tpu.vector_store %arg6[%c0_11, %c0_12], %13 {strides = array<i32>} : memref<128x8xf32, #tpu.memory_space<vmem>>, vector<128x8xf32>,
    } else {
    }
    %c0 = arith.constant 0 : index
    %c0_1 = arith.constant 0 : index
    %3 = vector.load %arg6[%c0, %c0_1] : memref<128x8xf32, #tpu.memory_space<vmem>>, vector<128x8xf32>
    %c0_2 = arith.constant 0 : index
    %c0_3 = arith.constant 0 : index
    %4 = vector.load %arg2[%c0_2, %c0_3] : memref<128x256xf32, #tpu.memory_space<vmem>>, vector<128x256xf32>
    %5 = arith.truncf %4 : vector<128x256xf32> to vector<128x256xbf16>
    %c0_4 = arith.constant 0 : index
    %c0_5 = arith.constant 0 : index
    %6 = vector.load %arg3[%c0_4, %c0_5] : memref<256x8xbf16, #tpu.memory_space<vmem>>, vector<256x8xbf16>
    %cst = arith.constant dense<0.000000e+00> : vector<128x8xf32>
    %7 = tpu.matmul %5, %6, %cst {dimension_numbers = #tpu.dot_dimension_numbers<[1], [0], [0], [1], [0, 0, 1, 1], [], []>} : vector<128x256xbf16>, vector<256x8xbf16>, vector<128x8xf32> -> vector<128x8xf32>
    %8 = arith.addf %3, %7 : vector<128x8xf32>
    %c0_6 = arith.constant 0 : index
    %c0_7 = arith.constant 0 : index
    %9 = vector.load %arg6[%c0_6, %c0_7] : memref<128x8xf32, #tpu.memory_space<vmem>>, vector<128x8xf32>
    tpu.vector_store %arg6[%c0_6, %c0_7], %8 {strides = array<i32>} : memref<128x8xf32, #tpu.memory_space<vmem>>, vector<128x8xf32>,
    %c0_i32_8 = arith.constant 0 : i32
    %10 = arith.cmpi eq, %arg1, %c0_i32_8 : i32
    %11 = arith.extui %10 : i1 to i32
    %c0_i32_9 = arith.constant 0 : i32
    %12 = arith.cmpi ne, %11, %c0_i32_9 : i32
    scf.if %12 {
      %c0_10 = arith.constant 0 : index
      %c0_11 = arith.constant 0 : index
      %13 = vector.load %arg4[%c0_10, %c0_11] : memref<128x8xf32, #tpu.memory_space<vmem>>, vector<128x8xf32>
      %c0_12 = arith.constant 0 : index
      %c0_13 = arith.constant 0 : index
      %14 = vector.load %arg6[%c0_12, %c0_13] : memref<128x8xf32, #tpu.memory_space<vmem>>, vector<128x8xf32>
      %15 = arith.mulf %13, %14 : vector<128x8xf32>
      %16 = vector.shape_cast %15 : vector<128x8xf32> to vector<1x128x8xf32>
      %cst_14 = arith.constant dense<0.000000e+00> : vector<1xf32>
      %17 = vector.multi_reduction <add>, %16, %cst_14 [1, 2] : vector<1x128x8xf32> to vector<1xf32>
      %18 = vector.shape_cast %17 : vector<1xf32> to vector<1x1x1xf32>
      %19 = vector.extract %18[0, 0, 0] : f32 from vector<1x1x1xf32>
      %20 = vector.broadcast %19 : f32 to vector<1x8x128xf32>
      %c0_15 = arith.constant 0 : index
      %c0_16 = arith.constant 0 : index
      %c0_17 = arith.constant 0 : index
      %21 = vector.load %arg5[%c0_15, %c0_16, %c0_17] : memref<1x8x128xf32, #tpu.memory_space<vmem>>, vector<1x8x128xf32>
      tpu.vector_store %arg5[%c0_15, %c0_16, %c0_17], %20 {strides = array<i32>} : memref<1x8x128xf32, #tpu.memory_space<vmem>>, vector<1x8x128xf32>,
    } else {
    }
    return
  }
  func.func @transform_0(%arg0: i32, %arg1: i32) -> (i32, i32) {
    %c0_i32 = arith.constant 0 : i32
    return %arg0, %arg1 : i32, i32
  }
  func.func @transform_1(%arg0: i32, %arg1: i32) -> (i32, i32) {
    %c0_i32 = arith.constant 0 : i32
    %c0_i32_0 = arith.constant 0 : i32
    return %arg1, %c0_i32 : i32, i32
  }
  func.func @transform_2(%arg0: i32, %arg1: i32) -> (i32, i32) {
    %c0_i32 = arith.constant 0 : i32
    %c0_i32_0 = arith.constant 0 : i32
    return %arg0, %c0_i32 : i32, i32
  }
  func.func @transform_3(%arg0: i32, %arg1: i32) -> (i32, i32, i32) {
    %c0_i32 = arith.constant 0 : i32
    %c0_i32_0 = arith.constant 0 : i32
    %c0_i32_1 = arith.constant 0 : i32
    return %arg0, %c0_i32, %c0_i32_0 : i32, i32, i32
  }
}

</mosaic_0001>

<bundles_post_ra>
// kernel: gap_loss.1
= control target key start
LH: loop header
LB: loop body
LE: loop exit
PB: predicated region body
PF: predicated region fallthrough
CT: control target
= control target key end

     0   :  { %8 = vsyncpa [#allocation4], 0  ;;  %s1334_s0 = inlined_call_operand.hbm [shape: f32[256,256], index: 0, kind: input, shape index: {}]   ;;  %s1335_s1 = inlined_call_operand.vmem [shape: bf16[256,8], index: 1, kind: input, shape index: {}]   ;;  %s1336_s2 = inlined_call_operand.vmem [shape: f32[256,8], index: 2, kind: input, shape index: {}]   ;;  %s1337_s3 = inlined_call_operand.vmem [shape: f32[2,8,128], index: 3, kind: output, shape index: {}]  }
   0x1   :  { %10 = vsyncpa [#allocation4 + $0x1], 0  ;;  %s1086_s12 = smov 0   ;;  %s1088_s13 = smov 0  }
   0x2   :  { %s1090_s14 = smov 0   ;;  %s1092_s15 = smov 0  }
   0x3   :  { %s1094_s16 = smov 0   ;;  %s1096_s17 = smov 0  }
   0x4 LB: > { %s792_s18 = sadd.s32 4294967295, %s1060_s17   ;;  %s28_s19 = sadd.s32 1, %s1056_s16  ;;  %s1060_s17 = sphi %s1096_s17, %s16_s17   ;;  %s1056_s16 = sphi %s1094_s16, %s1345_s16   ;;  %s1052_s15 = sphi %s1092_s15, %s1344_s15   ;;  %s1048_s14 = sphi %s1090_s14, %s1343_s14   ;;  %s1044_s13 = sphi %s1088_s13, %s1342_s13   ;;  %s1040_s12 = sphi %s1086_s12, %s1341_s12  }
   0x5   : > { %p30_p0 = scmp.ge.s32.totalorder %s28_s19, 2  ;;  %s37_s20 = sadd.s32 1, %s1048_s14 }
   0x6   : > { %p44_p1 = scmp.ne.s32.totalorder %s1048_s14, %s1044_s13  ;;  %p45_p2 = scmp.eq.s32.totalorder %s1060_s17, 0 }
   0x7   : > { %s1347_s19 = smov (%p30_p0, %s28_s19), 0  ;;  %p50_p4 = scmp.ne.s32.totalorder %s1044_s13, %s1040_s12 }
   0x8   : > { %p1122_p3 = por %p45_p2, %p44_p1  ;;  %s32_s22 = ssub.s32 %s1056_s16, %s1347_s19 }
   0x9   : > { %p51_p5 = scmp.eq.s32.totalorder %s792_s18, 0  ;;  %p35_p6 = scmp.eq.s32.totalorder %s32_s22, 0 }
   0xa   : > { %p914_p8 = scmp.lt.s32.totalorder %s1060_s17, 2  ;;  %s161_s25 = sand.u32 1, %s1048_s14  }
   0xb   : > { %p1129_p7 = por %p51_p5, %p50_p4  ;;  %s825_s26 = sshll.u32 %s1056_s16, 12 }
   0xc   : > { %s1135_s24 = scalar_select %p35_p6, %s1048_s14, %s37_s20  }
   0xd   : > { %s797_s27 = sshll.u32 %s161_s25, 8  ;;  %s174_s30 = scalar_lea.hbm %s1334_s0, %s825_s26 }
   0xe   : > { %s165_s4 = scalar_lea.vmem [#allocation3], %s797_s27  ;;  %p1144_p9 = pnand %p914_p8, %p1122_p3 }
   0xf   : > { %s175_s5 = sshll.u32 %s165_s4, 4  ;;  %s162_s7 = scalar_lea.sflag [#allocation4], %s161_s25  ;;  %s176_s5 = int_to_ptr.vmem [resolvable:$true] %s175_s5 }
  0x10   : > { %p984_p10 = pneg %p1144_p9  ;;  %s995_s8 = scalar_lea.vmem %s176_s5, 4096 }
  0x11   : > { %p996_p11 = scmp.ne.s32.totalorder %s176_s5, %s995_s8  ;;  %s1062_s9 = smov [#allocation3]  }
  0x12   : > { %s1000_s10 = sshll.u32 %s1062_s9, 4  ;;  %s1001_s10 = int_to_ptr.vmem [resolvable:$false] %s1000_s10 }
  0x13   : > { %p998_p12 = pnand %p996_p11, %p984_p10  ;;  %s1002_s11 = scalar_lea.vmem %s1001_s10, 8192 }
  0x14   : > { %p1003_p0 = scmp.lt.s32.totalorder %s176_s5, %s1001_s10  ;;  %p1004_p1 = scmp.lt.s32.totalorder %s1002_s11, %s995_s8 }
  0x15   : > { %p999_p13 = pneg %p998_p12 }
  0x16   : > { %p1005_p2 = por %p1004_p1, %p1003_p0 }
  0x18   : > { %p1006_p3 = pnand %p1005_p2, %p999_p13 }
  0x1a   : > { %1009 = shalt.err (!%p1006_p3)
}
  0x1b   : > { %s1063_s12 = smov 256   ;;  %s1064_s18 = smov 16  }
  0x1c   : > { %913 = dma.hbm_to_vmem [thread:$0]  (!%p1144_p9), %s174_s30, 4096, %s176_s5, %s162_s7, %s1063_s12, %s1063_s12, %s1064_s18  }
  0x1d   : > { %p801_p4 = scmp.ge.s32.totalorder %s1060_s17, 1  ;;  %p192_p5 = scmp.lt.s32.totalorder %s1060_s17, 3 }
  0x1f   : > { %p193_p6 = pnand %p801_p4, %p192_p5 }
  0x20   : > { %s198_s20 = sand.u32 (!%p193_p6), 1, %s1044_s13  }
  0x21   : > { %196 = sbr.rel (%p193_p6) target bundleno = 530 (0x212), region = 32  ;;  %s802_s21 = sshll.u32 (!%p193_p6), %s198_s20, 8 }
  0x22   : > { %s199_s22 = scalar_lea.sflag (!%p193_p6), [#allocation4], %s198_s20  ;;  %s1155_s25 = scalar_lea.vmem (!%p193_p6), [#allocation3], %s802_s21 }
  0x26   : > { %1035 = dma.done.wait (%p1129_p7), %s199_s22, 4096  }
  0x27   : > { %1037 = vsyncadd (%p1129_p7), %s199_s22, 4294963200  ;;  %v966_v0 = vld [vmem:[%s1335_s1 + $0x78] sm:$0xff]   ;;  %v968_v2 = vld [vmem:[%s1335_s1 + $0x70] sm:$0xff]   ;;  %vm257_vm0 = vcmask 64512   ;;  %p248_p8 = scmp.lt.s32.totalorder %s1052_s15, 1 }
  0x28   : > { %v967_v1 = vld [vmem:[%s1335_s1 + $0x38] sm:$0xff]   ;;  %826 = vmatprep.subr.bf16.mxu0 %v966_v0  ;;  %890 = vmatprep.subr.bf16.mxu1 %v966_v0  ;;  %v969_v3 = vld [vmem:[%s1335_s1 + $0x30] sm:$0xff]   ;;  %v970_v4 = vld [vmem:[%s1335_s1 + $0x68] sm:$0xff]   ;;  %v1065_v0 = vmov 0.0  }
  0x29   : > { %827 = vmatpush3.bf16.msra.mxu0 %v967_v1  ;;  %898 = vmatpush3.bf16.msra.mxu1 %v967_v1  ;;  %v971_v5 = vld [vmem:[%s1335_s1 + $0x28] sm:$0xff]   ;;  %v972_v6 = vld [vmem:[%s1335_s1 + $0x60] sm:$0xff]   ;;  %v974_v8 = vld [vmem:[%s1335_s1 + $0x58] sm:$0xff]   ;;  %258 = vst.msk [vmem:[#allocation2] sm:$0xff] %vm257_vm0, %v1065_v0 }
  0x2a   : > { %828 = vmatprep.subr.bf16.mxu0 %v968_v2  ;;  %891 = vmatprep.subr.bf16.mxu1 %v968_v2  ;;  %v973_v7 = vld [vmem:[%s1335_s1 + $0x20] sm:$0xff]   ;;  %v975_v9 = vld [vmem:[%s1335_s1 + $0x18] sm:$0xff]   ;;  %v976_v10 = vld [vmem:[%s1335_s1 + $0x50] sm:$0xff]   ;;  %259 = vst.msk [vmem:[#allocation2 + $0x8] sm:$0xff] %vm257_vm0, %v1065_v0 }
  0x2b   : > { %v291_v11 = vld [vmem:[%s1155_s25 + $0x8] sm:$0xff]  ;;  %v293_v12 = vld [vmem:[%s1155_s25 + $0x18] sm:$0xff]  ;;  %v977_v15 = vld [vmem:[%s1335_s1 + $0x10] sm:$0xff]   ;;  %260 = vst.msk [vmem:[#allocation2 + $0x10] sm:$0xff] %vm257_vm0, %v1065_v0 }
  0x2c   : > { %v323_v13 = vpack.c.bf16 %v293_v12, %v291_v11  ;;  %v307_v14 = vld [vmem:[%s1155_s25 + $0x88] sm:$0xff]  ;;  %v309_v16 = vld [vmem:[%s1155_s25 + $0x98] sm:$0xff]  ;;  %v980_v20 = vld [vmem:[%s1335_s1 + $0x40] sm:$0xff]   ;;  %261 = vst.msk [vmem:[#allocation2 + $0x18] sm:$0xff] %vm257_vm0, %v1065_v0 }
  0x2d   : > { %829 = vmatpush3.bf16.msra.mxu0 %v969_v3  ;;  %899 = vmatpush3.bf16.msra.mxu1 %v969_v3  ;;  %v978_v17 = vld [vmem:[%s1335_s1 + $0x48] sm:$0xff]   ;;  %v331_v18 = vpack.c.bf16 %v309_v16, %v307_v14  ;;  %v981_v21 = vld [vmem:[%s1335_s1] sm:$0xff]   ;;  %v292_v23 = vld [vmem:[%s1155_s25 + $0x10] sm:$0xff]  ;;  %262 = vst.msk [vmem:[#allocation2 + $0x20] sm:$0xff] %vm257_vm0, %v1065_v0 }
  0x2e   : > { %830 = vmatprep.subr.bf16.mxu0 %v970_v4  ;;  %892 = vmatprep.subr.bf16.mxu1 %v970_v4  ;;  %v979_v19 = vld [vmem:[%s1335_s1 + $0x8] sm:$0xff]   ;;  %v290_v22 = vld [vmem:[%s1155_s25] sm:$0xff]  ;;  %v308_v26 = vld [vmem:[%s1155_s25 + $0x90] sm:$0xff]  ;;  %263 = vst.msk [vmem:[#allocation2 + $0x28] sm:$0xff] %vm257_vm0, %v1065_v0 }
  0x2f   : > { %498 = vmatprep.mubr.bf16.mxu0 %v323_v13  ;;  %530 = vmatprep.mubr.bf16.mxu1 %v331_v18  ;;  %v295_v24 = vld [vmem:[%s1155_s25 + $0x28] sm:$0xff]  ;;  %v306_v25 = vld [vmem:[%s1155_s25 + $0x80] sm:$0xff]  ;;  %v297_v27 = vld [vmem:[%s1155_s25 + $0x38] sm:$0xff]  ;;  %v322_v30 = vpack.c.bf16 %v292_v23, %v290_v22  ;;  %264 = vst.msk [vmem:[#allocation2 + $0x30] sm:$0xff] %vm257_vm0, %v1065_v0 }
  0x30   : > { %v311_v28 = vld [vmem:[%s1155_s25 + $0xa8] sm:$0xff]  ;;  %v313_v29 = vld [vmem:[%s1155_s25 + $0xb8] sm:$0xff]  ;;  %v330_v31 = vpack.c.bf16 %v308_v26, %v306_v25  ;;  %v325_v32 = vpack.c.bf16 %v297_v27, %v295_v24  ;;  %v294_v34 = vld [vmem:[%s1155_s25 + $0x20] sm:$0xff]  ;;  %265 = vst.msk [vmem:[#allocation2 + $0x38] sm:$0xff] %vm257_vm0, %v1065_v0 }
  0x31   : > { %831 = vmatpush3.bf16.msra.mxu0 %v971_v5  ;;  %900 = vmatpush3.bf16.msra.mxu1 %v971_v5  ;;  %v333_v33 = vpack.c.bf16 %v313_v29, %v311_v28  ;;  %v296_v35 = vld [vmem:[%s1155_s25 + $0x30] sm:$0xff]  ;;  %v299_v36 = vld [vmem:[%s1155_s25 + $0x48] sm:$0xff]  ;;  %v310_v37 = vld [vmem:[%s1155_s25 + $0xa0] sm:$0xff]  ;;  %266 = vst.msk [vmem:[#allocation2 + $0x40] sm:$0xff] %vm257_vm0, %v1065_v0 }
  0x32   : > { %832 = vmatprep.subr.bf16.mxu0 %v972_v6  ;;  %893 = vmatprep.subr.bf16.mxu1 %v972_v6  ;;  %v312_v38 = vld [vmem:[%s1155_s25 + $0xb0] sm:$0xff]  ;;  %v301_v39 = vld [vmem:[%s1155_s25 + $0x58] sm:$0xff]  ;;  %v315_v40 = vld [vmem:[%s1155_s25 + $0xc8] sm:$0xff]  ;;  %v324_v42 = vpack.c.bf16 %v296_v35, %v294_v34  ;;  %267 = vst.msk [vmem:[#allocation2 + $0x48] sm:$0xff] %vm257_vm0, %v1065_v0 }
  0x33   : > { %v317_v41 = vld [vmem:[%s1155_s25 + $0xd8] sm:$0xff]  ;;  %v332_v43 = vpack.c.bf16 %v312_v38, %v310_v37  ;;  %v327_v44 = vpack.c.bf16 %v301_v39, %v299_v36  ;;  %v298_v46 = vld [vmem:[%s1155_s25 + $0x40] sm:$0xff]  ;;  %v300_v47 = vld [vmem:[%s1155_s25 + $0x50] sm:$0xff]  ;;  %268 = vst.msk [vmem:[#allocation2 + $0x50] sm:$0xff] %vm257_vm0, %v1065_v0 }
  0x34   : > { %v335_v45 = vpack.c.bf16 %v317_v41, %v315_v40  ;;  %v303_v48 = vld [vmem:[%s1155_s25 + $0x68] sm:$0xff]  ;;  %v314_v49 = vld [vmem:[%s1155_s25 + $0xc0] sm:$0xff]  ;;  %v316_v50 = vld [vmem:[%s1155_s25 + $0xd0] sm:$0xff]  ;;  %v326_v54 = vpack.c.bf16 %v300_v47, %v298_v46  ;;  %269 = vst.msk [vmem:[#allocation2 + $0x58] sm:$0xff] %vm257_vm0, %v1065_v0 }
  0x35   : > { %833 = vmatpush3.bf16.msra.mxu0 %v973_v7  ;;  %901 = vmatpush3.bf16.msra.mxu1 %v973_v7  ;;  %v305_v51 = vld [vmem:[%s1155_s25 + $0x78] sm:$0xff]  ;;  %v319_v52 = vld [vmem:[%s1155_s25 + $0xe8] sm:$0xff]  ;;  %v334_v55 = vpack.c.bf16 %v316_v50, %v314_v49  ;;  %v302_v58 = vld [vmem:[%s1155_s25 + $0x60] sm:$0xff]  ;;  %270 = vst.msk [vmem:[#allocation2 + $0x60] sm:$0xff] %vm257_vm0, %v1065_v0 }
  0x36   : > { %834 = vmatprep.subr.bf16.mxu0 %v974_v8  ;;  %894 = vmatprep.subr.bf16.mxu1 %v974_v8  ;;  %v321_v53 = vld [vmem:[%s1155_s25 + $0xf8] sm:$0xff]  ;;  %v329_v56 = vpack.c.bf16 %v305_v51, %v303_v48  ;;  %v304_v59 = vld [vmem:[%s1155_s25 + $0x70] sm:$0xff]  ;;  %v318_v60 = vld [vmem:[%s1155_s25 + $0xe0] sm:$0xff]  ;;  %271 = vst.msk [vmem:[#allocation2 + $0x68] sm:$0xff] %vm257_vm0, %v1065_v0 }
  0x37   : > { %v337_v57 = vpack.c.bf16 %v321_v53, %v319_v52  ;;  %v320_v61 = vld [vmem:[%s1155_s25 + $0xf0] sm:$0xff]  ;;  %v328_v62 = vpack.c.bf16 %v304_v59, %v302_v58  ;;  %272 = vst.msk [vmem:[#allocation2 + $0x70] sm:$0xff] %vm257_vm0, %v1065_v0  ;;  %273 = vst.msk [vmem:[#allocation2 + $0x78] sm:$0xff] %vm257_vm0, %v1065_v0  ;;  %v274_v3 = vld [vmem:[#allocation2] sm:$0xff]  ;;  %s803_s25 = sshll.u32 %s1052_s15, 4  ;;  %s1351_s15 = smov (!%p248_p8, %s1052_s15), 1 }
  0x38   : > { %v336_v63 = vpack.c.bf16 %v320_v61, %v318_v60  ;;  %v282_v5 = vld [vmem:[#allocation2 + $0x40] sm:$0xff]  ;;  %v275_v13 = vld [vmem:[#allocation2 + $0x8] sm:$0xff]  ;;  %v276_v23 = vld [vmem:[#allocation2 + $0x10] sm:$0xff]  ;;  %p243_p7 = scmp.lt.s32.totalorder %s803_s25, 31  ;;  %s805_s21 = sshll.u32 %s1351_s15, 3 }
  0x39   : > { %835 = vmatpush3.bf16.msra.mxu0 %v975_v9  ;;  %902 = vmatpush3.bf16.msra.mxu1 %v975_v9  ;;  %v279_v53 = vld [vmem:[#allocation2 + $0x28] sm:$0xff]  ;;  %s251_s27 = scalar_lea.vmem %s1337_s3, %s805_s21 }
  0x3a   : > { %836 = vmatprep.subr.bf16.mxu0 %v976_v10  ;;  %895 = vmatprep.subr.bf16.mxu1 %v976_v10  ;;  %v284_v25 = vld [vmem:[#allocation2 + $0x50] sm:$0xff]  ;;  %s1349_s25 = smov (!%p243_p7, %s803_s25), 31 }
  0x3b   : > { %v285_v35 = vld [vmem:[#allocation2 + $0x58] sm:$0xff]  ;;  %s804_s11 = sshll.u32 %s1349_s25, 3 }
  0x3c   : > { %s1269_s20 = scalar_lea.vmem %s1336_s2, %s804_s11 }
  0x3d   : > { %837 = vmatpush3.bf16.msra.mxu0 %v977_v15  ;;  %903 = vmatpush3.bf16.msra.mxu1 %v977_v15  ;;  %v283_v15 = vld [vmem:[#allocation2 + $0x48] sm:$0xff] }
  0x3e   : > { %838 = vmatprep.subr.bf16.mxu0 %v978_v17  ;;  %896 = vmatprep.subr.bf16.mxu1 %v978_v17  ;;  %v600_v61 = vld [vmem:[%s1269_s20 + $0x8] sm:$0xff] }
  0x41   : > { %839 = vmatpush3.bf16.msra.mxu0 %v979_v19  ;;  %904 = vmatpush3.bf16.msra.mxu1 %v979_v19 }
  0x42   : > { %840 = vmatprep.subr.bf16.mxu0 %v980_v20  ;;  %897 = vmatprep.subr.bf16.mxu1 %v980_v20 }
  0x45   : > { %841 = vmatpush3.bf16.msra.mxu0 %v981_v21  ;;  %905 = vmatpush3.bf16.msra.mxu1 %v981_v21 }
  0x48   : > { %499 = vmatmul.mubr.bf16.vlgmr.msra.gmra.mxu0 %v322_v30  ;;  %531 = vmatmul.mubr.bf16.vlgmr.msra.gmra.mxu1 %v330_v31 }
  0x49   : > { %506 = vmatprep.mubr.bf16.mxu0 %v325_v32  ;;  %538 = vmatprep.mubr.bf16.mxu1 %v333_v33  ;;  %v277_v33 = vld [vmem:[#allocation2 + $0x18] sm:$0xff] }
  0x50   : > { %507 = vmatmul.mubr.bf16.gmra.mxu0 %v324_v42  ;;  %539 = vmatmul.mubr.bf16.gmra.mxu1 %v332_v43  ;;  %v278_v43 = vld [vmem:[#allocation2 + $0x20] sm:$0xff] }
  0x51   : > { %514 = vmatprep.mubr.bf16.mxu0 %v327_v44  ;;  %546 = vmatprep.mubr.bf16.mxu1 %v335_v45  ;;  %v286_v45 = vld [vmem:[#allocation2 + $0x60] sm:$0xff] }
  0x58   : > { %515 = vmatmul.mubr.bf16.gmra.mxu0 %v326_v54  ;;  %547 = vmatmul.mubr.bf16.gmra.mxu1 %v334_v55  ;;  %v287_v55 = vld [vmem:[#allocation2 + $0x68] sm:$0xff] }
  0x59   : > { %522 = vmatprep.mubr.bf16.mxu0 %v329_v56  ;;  %554 = vmatprep.mubr.bf16.mxu1 %v337_v57 }
  0x60   : > { %523 = vmatmul.mubr.bf16.gmra.mxu0 %v328_v62  ;;  %555 = vmatmul.mubr.bf16.gmra.mxu1 %v336_v63 }
 0x108   : > { %v842_v1 = vpop.f32.mrf.mxu0  ;;  %v866_v2 = vpop.f32.mrf.mxu1 }
 0x10a   : > { %v843_v4 = vpop.f32.mrf.mxu0  ;;  %v867_v6 = vpop.f32.mrf.mxu1 }
 0x10b   : > { %v844_v7 = vadd.f32 %v843_v4, %v842_v1  ;;  %v868_v8 = vadd.f32 %v867_v6, %v866_v2  ;;  %v599_v1 = vld [vmem:[%s1269_s20] sm:$0xff]  ;;  %v601_v2 = vld [vmem:[%s1269_s20 + $0x10] sm:$0xff] }
 0x10c   : > { %v845_v9 = vpop.f32.mrf.mxu0  ;;  %v869_v10 = vpop.f32.mrf.mxu1  ;;  %v280_v4 = vld [vmem:[#allocation2 + $0x30] sm:$0xff] }
 0x10d   : > { %v563_v11 = vadd.f32 %v844_v7, %v274_v3  ;;  %v571_v12 = vadd.f32 %v868_v8, %v282_v5  ;;  %v288_v6 = vld [vmem:[#allocation2 + $0x70] sm:$0xff] }
 0x10e   : > { %v846_v14 = vpop.f32.mrf.mxu0  ;;  %v870_v16 = vpop.f32.mrf.mxu1 }
 0x10f   : > { %580 = vst.msk [vmem:[#allocation2] sm:$0xff] %vm257_vm0, %v563_v11  ;;  %v847_v17 = vadd.f32 %v846_v14, %v845_v9  ;;  %588 = vst.msk [vmem:[#allocation2 + $0x40] sm:$0xff] %vm257_vm0, %v571_v12  ;;  %v871_v18 = vadd.f32 %v870_v16, %v869_v10  ;;  %v602_v14 = vld [vmem:[%s1269_s20 + $0x18] sm:$0xff] }
 0x110   : > { %v848_v19 = vpop.f32.mrf.mxu0  ;;  %v872_v20 = vpop.f32.mrf.mxu1 }
 0x111   : > { %v564_v21 = vadd.f32 %v847_v17, %v275_v13  ;;  %v572_v22 = vadd.f32 %v871_v18, %v283_v15 }
 0x112   : > { %v849_v24 = vpop.f32.mrf.mxu0  ;;  %v873_v26 = vpop.f32.mrf.mxu1 }
 0x113   : > { %581 = vst.msk [vmem:[#allocation2 + $0x8] sm:$0xff] %vm257_vm0, %v564_v21  ;;  %v850_v27 = vadd.f32 %v849_v24, %v848_v19  ;;  %589 = vst.msk [vmem:[#allocation2 + $0x48] sm:$0xff] %vm257_vm0, %v572_v22  ;;  %v874_v28 = vadd.f32 %v873_v26, %v872_v20  ;;  %v603_v19 = vld [vmem:[%s1269_s20 + $0x20] sm:$0xff]  ;;  %v281_v21 = vld [vmem:[#allocation2 + $0x38] sm:$0xff] }
 0x114   : > { %v851_v29 = vpop.f32.mrf.mxu0  ;;  %v875_v30 = vpop.f32.mrf.mxu1 }
 0x115   : > { %v565_v31 = vadd.f32 %v850_v27, %v276_v23  ;;  %v573_v32 = vadd.f32 %v874_v28, %v284_v25  ;;  %v289_v23 = vld [vmem:[#allocation2 + $0x78] sm:$0xff] }
 0x116   : > { %v852_v34 = vpop.f32.mrf.mxu0  ;;  %v876_v36 = vpop.f32.mrf.mxu1  ;;  %v615_v3 = vld [vmem:[#allocation2] sm:$0xff] }
 0x117   : > { %582 = vst.msk [vmem:[#allocation2 + $0x10] sm:$0xff] %vm257_vm0, %v565_v31  ;;  %v853_v37 = vadd.f32 %v852_v34, %v851_v29  ;;  %590 = vst.msk [vmem:[#allocation2 + $0x50] sm:$0xff] %vm257_vm0, %v573_v32  ;;  %v877_v38 = vadd.f32 %v876_v36, %v875_v30  ;;  %v631_v16 = vmul.f32 %v615_v3, %v599_v1  ;;  %v604_v30 = vld [vmem:[%s1269_s20 + $0x28] sm:$0xff] }
 0x118   : > { %v854_v39 = vpop.f32.mrf.mxu0  ;;  %v878_v40 = vpop.f32.mrf.mxu1 }
 0x119   : > { %v566_v41 = vadd.f32 %v853_v37, %v277_v33  ;;  %v574_v42 = vadd.f32 %v877_v38, %v285_v35  ;;  %v647_v31 = vsel %vm257_vm0, %v631_v16, 0.0 }
 0x11a   : > { %v855_v44 = vpop.f32.mrf.mxu0  ;;  %v879_v46 = vpop.f32.mrf.mxu1  ;;  %v616_v62 = vld [vmem:[#allocation2 + $0x8] sm:$0xff] }
 0x11b   : > { %583 = vst.msk [vmem:[#allocation2 + $0x18] sm:$0xff] %vm257_vm0, %v566_v41  ;;  %v856_v47 = vadd.f32 %v855_v44, %v854_v39  ;;  %591 = vst.msk [vmem:[#allocation2 + $0x58] sm:$0xff] %vm257_vm0, %v574_v42  ;;  %v880_v48 = vadd.f32 %v879_v46, %v878_v40  ;;  %v632_v11 = vmul.f32 %v616_v62, %v600_v61  ;;  %v605_v40 = vld [vmem:[%s1269_s20 + $0x30] sm:$0xff] }
 0x11c   : > { %v857_v49 = vpop.f32.mrf.mxu0  ;;  %v881_v50 = vpop.f32.mrf.mxu1 }
 0x11d   : > { %v567_v51 = vadd.f32 %v856_v47, %v278_v43  ;;  %v575_v52 = vadd.f32 %v880_v48, %v286_v45  ;;  %v648_v29 = vsel %vm257_vm0, %v632_v11, 0.0  ;;  %v606_v47 = vld [vmem:[%s1269_s20 + $0x38] sm:$0xff]  ;;  %v607_v48 = vld [vmem:[%s1269_s20 + $0x40] sm:$0xff] }
 0x11e   : > { %v858_v54 = vpop.f32.mrf.mxu0  ;;  %v882_v56 = vpop.f32.mrf.mxu1  ;;  %v617_v8 = vld [vmem:[#allocation2 + $0x10] sm:$0xff]  ;;  %v649_v37 = vadd.f32 %v648_v29, %v647_v31 }
 0x11f   : > { %584 = vst.msk [vmem:[#allocation2 + $0x20] sm:$0xff] %vm257_vm0, %v567_v51  ;;  %v859_v57 = vadd.f32 %v858_v54, %v857_v49  ;;  %592 = vst.msk [vmem:[#allocation2 + $0x60] sm:$0xff] %vm257_vm0, %v575_v52  ;;  %v883_v58 = vadd.f32 %v882_v56, %v881_v50  ;;  %v633_v20 = vmul.f32 %v617_v8, %v601_v2  ;;  %v623_v49 = vld [vmem:[#allocation2 + $0x40] sm:$0xff]  ;;  %v608_v52 = vld [vmem:[%s1269_s20 + $0x48] sm:$0xff] }
 0x120   : > { %v860_v59 = vpop.f32.mrf.mxu0  ;;  %v884_v60 = vpop.f32.mrf.mxu1  ;;  %v624_v54 = vld [vmem:[#allocation2 + $0x48] sm:$0xff] }
 0x121   : > { %v568_v63 = vadd.f32 %v859_v57, %v279_v53  ;;  %v576_v0 = vadd.f32 %v883_v58, %v287_v55  ;;  %v650_v35 = vsel %vm257_vm0, %v633_v20, 0.0  ;;  %v639_v57 = vmul.f32 %v623_v49, %v607_v48  ;;  %v609_v58 = vld [vmem:[%s1269_s20 + $0x50] sm:$0xff] }
 0x122   : > { %v861_v5 = vpop.f32.mrf.mxu0  ;;  %v885_v7 = vpop.f32.mrf.mxu1  ;;  %v618_v15 = vld [vmem:[#allocation2 + $0x18] sm:$0xff]  ;;  %v651_v41 = vadd.f32 %v650_v35, %v649_v37  ;;  %v640_v61 = vmul.f32 %v624_v54, %v608_v52 }
 0x123   : > { %585 = vst.msk [vmem:[#allocation2 + $0x28] sm:$0xff] %vm257_vm0, %v568_v63  ;;  %v862_v9 = vadd.f32 %v861_v5, %v860_v59  ;;  %593 = vst.msk [vmem:[#allocation2 + $0x68] sm:$0xff] %vm257_vm0, %v576_v0  ;;  %v886_v10 = vadd.f32 %v885_v7, %v884_v60  ;;  %v634_v28 = vmul.f32 %v618_v15, %v602_v14  ;;  %v625_v59 = vld [vmem:[#allocation2 + $0x50] sm:$0xff]  ;;  %v610_v63 = vld [vmem:[%s1269_s20 + $0x58] sm:$0xff]  ;;  %v662_v3 = vsel %vm257_vm0, %v639_v57, 0.0 }
 0x124   : > { %v863_v12 = vpop.f32.mrf.mxu0  ;;  %v887_v13 = vpop.f32.mrf.mxu1  ;;  %v626_v0 = vld [vmem:[#allocation2 + $0x58] sm:$0xff]  ;;  %v641_v2 = vmul.f32 %v625_v59, %v609_v58  ;;  %v664_v8 = vsel %vm257_vm0, %v640_v61, 0.0  ;;  %v613_v14 = vld [vmem:[%s1269_s20 + $0x70] sm:$0xff] }
 0x125   : > { %v569_v17 = vadd.f32 %v862_v9, %v280_v4  ;;  %v577_v18 = vadd.f32 %v886_v10, %v288_v6  ;;  %v652_v39 = vsel %vm257_vm0, %v634_v28, 0.0  ;;  %v611_v4 = vld [vmem:[%s1269_s20 + $0x60] sm:$0xff]  ;;  %v642_v7 = vmul.f32 %v626_v0, %v610_v63  ;;  %v612_v9 = vld [vmem:[%s1269_s20 + $0x68] sm:$0xff] }
 0x126   : > { %v864_v22 = vpop.f32.mrf.mxu0  ;;  %v888_v24 = vpop.f32.mrf.mxu1  ;;  %v619_v25 = vld [vmem:[#allocation2 + $0x20] sm:$0xff]  ;;  %v653_v44 = vadd.f32 %v652_v39, %v651_v41 }
 0x127   : > { %586 = vst.msk [vmem:[#allocation2 + $0x30] sm:$0xff] %vm257_vm0, %v569_v17  ;;  %v865_v26 = vadd.f32 %v864_v22, %v863_v12  ;;  %594 = vst.msk [vmem:[#allocation2 + $0x70] sm:$0xff] %vm257_vm0, %v577_v18  ;;  %v889_v27 = vadd.f32 %v888_v24, %v887_v13  ;;  %v635_v34 = vmul.f32 %v619_v25, %v603_v19  ;;  %v627_v5 = vld [vmem:[#allocation2 + $0x60] sm:$0xff]  ;;  %v666_v13 = vsel %vm257_vm0, %v641_v2, 0.0  ;;  %v614_v19 = vld [vmem:[%s1269_s20 + $0x78] sm:$0xff] }
 0x128   : > { %v643_v12 = vmul.f32 %v627_v5, %v611_v4  ;;  %v668_v18 = vsel %vm257_vm0, %v642_v7, 0.0 }
 0x129   : > { %v570_v32 = vadd.f32 %v865_v26, %v281_v21  ;;  %v578_v33 = vadd.f32 %v889_v27, %v289_v23  ;;  %v654_v42 = vsel %vm257_vm0, %v635_v34, 0.0 }
 0x12a   : > { %v620_v36 = vld [vmem:[#allocation2 + $0x28] sm:$0xff]  ;;  %v655_v50 = vadd.f32 %v654_v42, %v653_v44  ;;  %v670_v23 = vsel %vm257_vm0, %v643_v12, 0.0 }
 0x12b   : > { %587 = vst.msk [vmem:[#allocation2 + $0x38] sm:$0xff] %vm257_vm0, %v570_v32  ;;  %595 = vst.msk [vmem:[#allocation2 + $0x78] sm:$0xff] %vm257_vm0, %v578_v33  ;;  %v636_v38 = vmul.f32 %v620_v36, %v604_v30  ;;  %v628_v10 = vld [vmem:[#allocation2 + $0x68] sm:$0xff] }
 0x12c   : > { %v644_v17 = vmul.f32 %v628_v10, %v612_v9 }
 0x12d   : > { %v656_v46 = vsel %vm257_vm0, %v636_v38, 0.0 }
 0x12e   : > { %v621_v43 = vld [vmem:[#allocation2 + $0x30] sm:$0xff]  ;;  %v657_v55 = vadd.f32 %v656_v46, %v655_v50  ;;  %v672_v26 = vsel %vm257_vm0, %v644_v17, 0.0 }
 0x12f   : > { %v637_v45 = vmul.f32 %v621_v43, %v605_v40  ;;  %v629_v15 = vld [vmem:[#allocation2 + $0x70] sm:$0xff] }
 0x130   : > { %v645_v22 = vmul.f32 %v629_v15, %v613_v14 }
 0x131   : > { %v658_v51 = vsel %vm257_vm0, %v637_v45, 0.0 }
 0x132   : > { %v622_v53 = vld [vmem:[#allocation2 + $0x38] sm:$0xff]  ;;  %v659_v60 = vadd.f32 %v658_v51, %v657_v55  ;;  %v674_v28 = vsel %vm257_vm0, %v645_v22, 0.0 }
 0x133   : > { %v638_v56 = vmul.f32 %v622_v53, %v606_v47  ;;  %v630_v20 = vld [vmem:[#allocation2 + $0x78] sm:$0xff] }
 0x134   : > { %v646_v25 = vmul.f32 %v630_v20, %v614_v19 }
 0x135   : > { %v660_v62 = vsel %vm257_vm0, %v638_v56, 0.0 }
 0x136   : > { %v661_v1 = vadd.f32 %v660_v62, %v659_v60  ;;  %v676_v30 = vsel %vm257_vm0, %v646_v25, 0.0 }
 0x138   : > { %v663_v6 = vadd.f32 %v662_v3, %v661_v1 }
 0x13a   : > { %v665_v11 = vadd.f32 %v664_v8, %v663_v6 }
 0x13c   : > { %v667_v16 = vadd.f32 %v666_v13, %v665_v11 }
 0x13e   : > { %v669_v21 = vadd.f32 %v668_v18, %v667_v16 }
 0x140   : > { %v671_v24 = vadd.f32 %v670_v23, %v669_v21 }
 0x142   : > { %v673_v27 = vadd.f32 %v672_v26, %v671_v24 }
 0x144   : > { %v675_v29 = vadd.f32 %v674_v28, %v673_v27 }
 0x146   : > { %v677_v31 = vadd.f32 %v676_v30, %v675_v29 }
 0x148   : > { %678 = vadd.xlane.f32.xlu0 %v677_v31 }
 0x1d1   : > { %v679_v32 = vpop.xlane.xlu0 %678 }
 0x1d2   : > { %v680_v33 = vrot.slane %v679_v32, 4 }
 0x1d4   : > { %v681_v34 = vadd.f32 %v680_v33, %v679_v32 }
 0x1d6   : > { %v682_v35 = vrot.slane %v681_v34, 2 }
 0x1d8   : > { %v683_v36 = vadd.f32 %v682_v35, %v681_v34 }
 0x1da   : > { %v684_v37 = vrot.slane %v683_v36, 1 }
 0x1dc   : > { %v685_v38 = vadd.f32 %v684_v37, %v683_v36 }
 0x1de   : > { %906 = vpush %v685_v38 }
 0x20f   : > { %s907_s28 = spop %906 }
 0x210   : > { %v687_v39 = vstv %s907_s28 }
 0x211   : > { %688 = vst [vmem:[%s251_s27] sm:$0xff] %v687_v39 }
 0x212 PF: > { %s16_s17 = sadd.s32 1, %s1060_s17   ;;  %s1341_s12 = smov %s1044_s13 }
 0x213   : > { %p13_p9 = scmp.ge.s32.totalorder %s16_s17, 4   ;;  %s1342_s13 = smov %s1048_s14 }
 0x214   : > { %s1343_s14 = smov %s1135_s24  ;;  %s1344_s15 = smov %s1056_s16 }
 0x215   : > { %s1345_s16 = smov %s1347_s19  ;;  %15 = sbr.rel (!%p13_p9) target bundleno = 4 (0x4), region = 86 }
 0x21a   :  { %708 = vsyncpa [#allocation4], 1 }
 0x21b   :  { %710 = vsyncpa [#allocation4 + $0x1], 1 }

</bundles_post_ra>
